<compile_context>
chip_gen: v7x
topology: tpu7x:2x2x1
jax: 0.10.0
libtpu: 0.0.40
codegen_flags: <defaults>
</compile_context>

<pallas_src>
import math
import functools

import numpy as np
import jax
import jax.numpy as jnp
from jax import lax
from jax.experimental import pallas as pl
from jax.experimental.pallas import tpu as pltpu


def _round_up(x, m):
    return (x + m - 1) // m * m


# ----------------------------- Pallas kernel --------------------------------
def finer_kernel(x_ref, w_ref, b_ref, o_ref, *, omega, is_last):
    # wx_b = x @ W.T + b : contract the in_features axis of both operands
    # (transposed-RHS contraction feeds the MXU directly; no weight.T copy).
    wx_b = lax.dot_general(
        x_ref[...], w_ref[...],
        dimension_numbers=(((1,), (1,)), ((), ())),
        preferred_element_type=jnp.float32,
    ) + b_ref[...]                                   # bias broadcast over batch

    if is_last:
        o_ref[...] = wx_b.astype(o_ref.dtype)
    else:
        # finer activation: sin(omega * (|wx_b| + 1) * wx_b)
        # abs/mul run on the VPU; sin goes to the EUP (separate VLIW slot).
        alpha = jnp.abs(wx_b) + 1.0
        o_ref[...] = jnp.sin(omega * alpha * wx_b).astype(o_ref.dtype)


# ------------------------------- wrapper -------------------------------------
def finer_layer(x, weight, bias, *, omega=30.0, is_last=False,
                block_b=512, matmul_dtype=jnp.float32):
    """FinerLayer forward. x: (B, in_f), weight: (out_f, in_f), bias: (out_f,)."""
    B, in_f = x.shape
    out_f, in_f_w = weight.shape
    assert in_f_w == in_f and bias.shape == (out_f,)

    # Lane-dense output: pad out_features to a multiple of 128 (sliced off below).
    out_p = _round_up(out_f, 128)
    # Sublane-aligned batch tiling.
    b_pad = _round_up(B, 8)
    tile_b = min(block_b, b_pad)
    b_pad = _round_up(b_pad, tile_b)

    x_p = jnp.pad(x, ((0, b_pad - B), (0, 0))) if b_pad != B else x
    w_p = jnp.pad(weight, ((0, out_p - out_f), (0, 0))) if out_p != out_f else weight
    b2d = jnp.pad(bias.reshape(1, out_f), ((0, 0), (0, out_p - out_f)))

    # Optionally run the MXU in bf16 (f32 accumulation) — pays off on v6e/v7x at scale.
    x_p = x_p.astype(matmul_dtype)
    w_p = w_p.astype(matmul_dtype)

    kernel = functools.partial(finer_kernel, omega=float(omega), is_last=bool(is_last))

    itemsize = jnp.dtype(matmul_dtype).itemsize
    cost = pl.CostEstimate(
        flops=2 * b_pad * in_f * out_p,
        transcendentals=0 if is_last else b_pad * out_p,
        bytes_accessed=(b_pad * in_f + out_p * in_f) * itemsize
                       + (out_p + b_pad * out_p) * 4,
    )

    out = pl.pallas_call(
        kernel,
        out_shape=jax.ShapeDtypeStruct((b_pad, out_p), jnp.float32),
        grid_spec=pltpu.PrefetchScalarGridSpec(
            num_scalar_prefetch=0,
            grid=(b_pad // tile_b,),
            in_specs=[
                pl.BlockSpec((tile_b, in_f), lambda i: (i, 0)),   # x: tiled over batch
                pl.BlockSpec((out_p, in_f), lambda i: (0, 0)),    # weight: VMEM-resident
                pl.BlockSpec((1, out_p), lambda i: (0, 0)),       # bias:   VMEM-resident
            ],
            out_specs=pl.BlockSpec((tile_b, out_p), lambda i: (i, 0)),
        ),
        compiler_params=pltpu.CompilerParams(
            dimension_semantics=("parallel",),        # megacore-shardable batch axis
        ),
        cost_estimate=cost,
    )(x_p, w_p, b2d)

    return out[:B, :out_f]


# -------------------- Deterministic parameter construction ------------------
def make_finer_params(key, in_features, out_features, *, omega=30.0, is_first=False,
                      fbs=1.0, init_method="sine", use_bias=True):
    """Mirrors FinerLayer init: sine-scheme uniform weights, fbs-bounded first-layer bias."""
    k_w, k_b = jax.random.split(key)
    if init_method.lower() == "sine":
        bound = (1.0 / in_features) if is_first else (math.sqrt(6.0 / in_features) / omega)
    else:
        bound = 1.0 / math.sqrt(in_features)
    weight = jax.random.uniform(k_w, (out_features, in_features),
                                minval=-bound, maxval=bound, dtype=jnp.float32)
    if not use_bias:
        return weight, jnp.zeros((out_features,), jnp.float32)
    if is_first and fbs is not None:
        b = jax.random.uniform(k_b, (out_features,), minval=-fbs, maxval=fbs,
                               dtype=jnp.float32)
    else:
        kb = 1.0 / math.sqrt(in_features)               # nn.Linear default bias init
        b = jax.random.uniform(k_b, (out_features,), minval=-kb, maxval=kb,
                               dtype=jnp.float32)
    return weight, b


# Pure-JAX reference for correctness check.
def finer_ref(x, weight, bias, omega=30.0, is_last=False):
    wx_b = jnp.dot(x, weight.T, precision=lax.Precision.HIGHEST) + bias[None, :]
    if is_last:
        return wx_b
    return jnp.sin(omega * (jnp.abs(wx_b) + 1.0) * wx_b)


if __name__ == "__main__":
    key = jax.random.PRNGKey(0)
    k_x, k_p = jax.random.split(key)

    B, in_features, out_features = 64, 64, 32
    omega = 30.0

    weight, bias = make_finer_params(k_p, in_features, out_features,
                                     omega=omega, is_first=True, fbs=1.0)
    x = jax.random.uniform(k_x, (B, in_features), minval=-1.0, maxval=1.0,
                           dtype=jnp.float32)

    # hidden layer (finer activation)
    out = finer_layer(x, weight, bias, omega=omega, is_last=False)
    out = jax.block_until_ready(out)
    ref = finer_ref(x, weight, bias, omega=omega, is_last=False)
    np.testing.assert_allclose(np.asarray(out), np.asarray(ref), rtol=1e-4, atol=1e-4)

    # last layer (pure linear)
    out_last = finer_layer(x, weight, bias, omega=omega, is_last=True)
    out_last = jax.block_until_ready(out_last)
    ref_last = finer_ref(x, weight, bias, omega=omega, is_last=True)
    np.testing.assert_allclose(np.asarray(out_last), np.asarray(ref_last),
                               rtol=1e-4, atol=1e-4)

    print("KERNEL_OK")
</pallas_src>

<mosaic_0001>
module attributes {stable_mosaic.version = 11 : i64} {
  func.func @finer_kernel(%arg0: i32, %arg1: memref<64x64xf32, #tpu.memory_space<vmem>>, %arg2: memref<128x64xf32, #tpu.memory_space<vmem>>, %arg3: memref<1x128xf32, #tpu.memory_space<vmem>>, %arg4: memref<64x128xf32, #tpu.memory_space<vmem>>) attributes {dimension_semantics = [#tpu.dimension_semantics<parallel>], iteration_bounds = array<i64: 1>, scalar_prefetch = 0 : i64, scratch_operands = 0 : i64, tpu.core_type = #tpu.core_type<tc>, window_params = [{transform_indices = @transform_0, window_bounds = array<i64: 64, 64>}, {pipeline_mode = #tpu.pipeline_mode<synchronous>, transform_indices = @transform_1, window_bounds = array<i64: 128, 64>}, {pipeline_mode = #tpu.pipeline_mode<synchronous>, transform_indices = @transform_2, window_bounds = array<i64: 1, 128>}, {transform_indices = @transform_3, window_bounds = array<i64: 64, 128>}]} {
    %c0 = arith.constant 0 : index
    %c0_0 = arith.constant 0 : index
    %0 = vector.load %arg1[%c0, %c0_0] : memref<64x64xf32, #tpu.memory_space<vmem>>, vector<64x64xf32>
    %c0_1 = arith.constant 0 : index
    %c0_2 = arith.constant 0 : index
    %1 = vector.load %arg2[%c0_1, %c0_2] : memref<128x64xf32, #tpu.memory_space<vmem>>, vector<128x64xf32>
    %cst = arith.constant dense<0.000000e+00> : vector<64x128xf32>
    %2 = tpu.matmul %0, %1, %cst {dimension_numbers = #tpu.dot_dimension_numbers<[1], [1], [0], [0], [0, 0, 1, 0], [], []>} : vector<64x64xf32>, vector<128x64xf32>, vector<64x128xf32> -> vector<64x128xf32>
    %c0_3 = arith.constant 0 : index
    %c0_4 = arith.constant 0 : index
    %3 = vector.load %arg3[%c0_3, %c0_4] : memref<1x128xf32, #tpu.memory_space<vmem>>, vector<1x128xf32>
    %4 = vector.broadcast %3 : vector<1x128xf32> to vector<64x128xf32>
    %5 = arith.addf %2, %4 : vector<64x128xf32>
    %6 = math.absf %5 : vector<64x128xf32>
    %cst_5 = arith.constant 1.000000e+00 : f32
    %7 = vector.broadcast %cst_5 : f32 to vector<64x128xf32>
    %8 = arith.addf %6, %7 : vector<64x128xf32>
    %cst_6 = arith.constant 3.000000e+01 : f32
    %9 = vector.broadcast %cst_6 : f32 to vector<64x128xf32>
    %10 = arith.mulf %9, %8 : vector<64x128xf32>
    %11 = arith.mulf %10, %5 : vector<64x128xf32>
    %12 = math.sin %11 : vector<64x128xf32>
    %c0_7 = arith.constant 0 : index
    %c0_8 = arith.constant 0 : index
    %13 = vector.load %arg4[%c0_7, %c0_8] : memref<64x128xf32, #tpu.memory_space<vmem>>, vector<64x128xf32>
    tpu.vector_store %arg4[%c0_7, %c0_8], %12 {strides = array<i32>} : memref<64x128xf32, #tpu.memory_space<vmem>>, vector<64x128xf32>,
    return
  }
  func.func @transform_0(%arg0: i32) -> (i32, i32) {
    %c0_i32 = arith.constant 0 : i32
    %c0_i32_0 = arith.constant 0 : i32
    return %arg0, %c0_i32 : i32, i32
  }
  func.func @transform_1(%arg0: i32) -> (i32, i32) {
    %c0_i32 = arith.constant 0 : i32
    %c0_i32_0 = arith.constant 0 : i32
    %c0_i32_1 = arith.constant 0 : i32
    return %c0_i32, %c0_i32_0 : i32, i32
  }
  func.func @transform_2(%arg0: i32) -> (i32, i32) {
    %c0_i32 = arith.constant 0 : i32
    %c0_i32_0 = arith.constant 0 : i32
    %c0_i32_1 = arith.constant 0 : i32
    return %c0_i32, %c0_i32_0 : i32, i32
  }
  func.func @transform_3(%arg0: i32) -> (i32, i32) {
    %c0_i32 = arith.constant 0 : i32
    %c0_i32_0 = arith.constant 0 : i32
    return %arg0, %c0_i32 : i32, i32
  }
}

</mosaic_0001>

<bundles_post_ra>
// kernel: tpu_custom_call.1
= control target key start
LH: loop header
LB: loop body
LE: loop exit
PB: predicated region body
PF: predicated region fallthrough
CT: control target
= control target key end

     0   :  { %vm46_vm0 = vcmask 523264   ;;  %s2238_s0 = inlined_call_operand.vmem [shape: f32[64,64], index: 0, kind: input, shape index: {}]   ;;  %s2239_s1 = inlined_call_operand.vmem [shape: f32[128,64], index: 1, kind: input, shape index: {}]   ;;  %s2240_s2 = inlined_call_operand.vmem [shape: f32[1,128], index: 2, kind: input, shape index: {}]   ;;  %s2241_s3 = inlined_call_operand.hbm [shape: f32[64,128], index: 3, kind: output, shape index: {}]  }
   0x1   :  { %v23_v0 = vld [vmem:[%s2239_s1] sm:$0xff]  ;;  %v24_v1 = vld [vmem:[%s2239_s1 + $0x8] sm:$0xff]  ;;  %v25_v2 = vld [vmem:[%s2239_s1 + $0x10] sm:$0xff] }
   0x2   :  { %v1237_v3 = vpack.c.bf16 %v24_v1, %v23_v0  ;;  %vm1439_vm1 = vmpackc.low %vm46_vm0, %vm46_vm0  ;;  %v26_v5 = vld [vmem:[%s2239_s1 + $0x18] sm:$0xff]  ;;  %v15_v7 = vld [vmem:[%s2238_s0] sm:$0xff] }
   0x3   :  { %v1243_v6 = vpack.c.bf16 %v26_v5, %v25_v2  ;;  %v27_v8 = vld [vmem:[%s2239_s1 + $0x20] sm:$0xff]  ;;  %v28_v9 = vld [vmem:[%s2239_s1 + $0x28] sm:$0xff]  ;;  %1225 = vmatprep.mubr.msk.f32.mxu0 %vm46_vm0, %v15_v7 }
   0x4   :  { %1239 = vmatprep.subr.msk.bf16.mxu0 %vm1439_vm1, %v1237_v3  ;;  %1285 = vmatprep.subr.msk.bf16.mxu1 %vm1439_vm1, %v1237_v3  ;;  %v19_v10 = vld [vmem:[%s2238_s0 + $0x20] sm:$0xff] }
   0x5   :  { %1242 = vmatpush3.bf16.xpose.msk.msra.mxu0 %vm1439_vm1, %v1237_v3  ;;  %1293 = vmatpush3.bf16.xpose.msk.msra.mxu1 %vm1439_vm1, %v1237_v3 }
   0x6   :  { %1245 = vmatprep.subr.msk.bf16.mxu0 %vm1439_vm1, %v1243_v6  ;;  %1286 = vmatprep.subr.msk.bf16.mxu1 %vm1439_vm1, %v1243_v6 }
   0x7   :  { %1231 = vmatprep.mubr.msk.f32.mxu1 %vm46_vm0, %v19_v10 }
   0x8   :  { %8 = vsyncpa [#allocation3], 0  ;;  %v1249_v11 = vpack.c.bf16 %v28_v9, %v27_v8  ;;  %v29_v12 = vld [vmem:[%s2239_s1 + $0x30] sm:$0xff]  ;;  %v30_v13 = vld [vmem:[%s2239_s1 + $0x38] sm:$0xff] }
   0x9   :  { %v1255_v14 = vpack.c.bf16 %v30_v13, %v29_v12  ;;  %v31_v15 = vld [vmem:[%s2239_s1 + $0x40] sm:$0xff]  ;;  %v32_v16 = vld [vmem:[%s2239_s1 + $0x48] sm:$0xff]  ;;  %v33_v18 = vld [vmem:[%s2239_s1 + $0x50] sm:$0xff] }
   0xa   :  { %v1261_v17 = vpack.c.bf16 %v32_v16, %v31_v15  ;;  %v34_v19 = vld [vmem:[%s2239_s1 + $0x58] sm:$0xff]  ;;  %v35_v21 = vld [vmem:[%s2239_s1 + $0x60] sm:$0xff]  ;;  %v36_v22 = vld [vmem:[%s2239_s1 + $0x68] sm:$0xff] }
   0xb   :  { %v1267_v20 = vpack.c.bf16 %v34_v19, %v33_v18  ;;  %v1273_v23 = vpack.c.bf16 %v36_v22, %v35_v21  ;;  %v37_v24 = vld [vmem:[%s2239_s1 + $0x70] sm:$0xff]  ;;  %v38_v25 = vld [vmem:[%s2239_s1 + $0x78] sm:$0xff]  ;;  %v16_v27 = vld [vmem:[%s2238_s0 + $0x8] sm:$0xff] }
   0xc   :  { %v1279_v26 = vpack.c.bf16 %v38_v25, %v37_v24  ;;  %v20_v28 = vld [vmem:[%s2238_s0 + $0x28] sm:$0xff]  ;;  %v17_v29 = vld [vmem:[%s2238_s0 + $0x10] sm:$0xff]  ;;  %v18_v31 = vld [vmem:[%s2238_s0 + $0x18] sm:$0xff] }
   0xd   :  { %1248 = vmatpush3.bf16.xpose.msk.msra.mxu0 %vm1439_vm1, %v1243_v6  ;;  %1294 = vmatpush3.bf16.xpose.msk.msra.mxu1 %vm1439_vm1, %v1243_v6  ;;  %v21_v30 = vld [vmem:[%s2238_s0 + $0x30] sm:$0xff]  ;;  %v22_v32 = vld [vmem:[%s2238_s0 + $0x38] sm:$0xff]  ;;  %v1112_v33 = vld [vmem:[%s2240_s2] ss:$0 sm:$0xff] }
   0xe   :  { %1251 = vmatprep.subr.msk.bf16.mxu0 %vm1439_vm1, %v1249_v11  ;;  %1287 = vmatprep.subr.msk.bf16.mxu1 %vm1439_vm1, %v1249_v11 }
  0x15   :  { %1254 = vmatpush3.bf16.xpose.msk.msra.mxu0 %vm1439_vm1, %v1249_v11  ;;  %1295 = vmatpush3.bf16.xpose.msk.msra.mxu1 %vm1439_vm1, %v1249_v11 }
  0x16   :  { %1257 = vmatprep.subr.msk.bf16.mxu0 %vm1439_vm1, %v1255_v14  ;;  %1288 = vmatprep.subr.msk.bf16.mxu1 %vm1439_vm1, %v1255_v14 }
  0x1d   :  { %1260 = vmatpush3.bf16.xpose.msk.msra.mxu0 %vm1439_vm1, %v1255_v14  ;;  %1296 = vmatpush3.bf16.xpose.msk.msra.mxu1 %vm1439_vm1, %v1255_v14 }
  0x1e   :  { %1263 = vmatprep.subr.msk.bf16.mxu0 %vm1439_vm1, %v1261_v17  ;;  %1289 = vmatprep.subr.msk.bf16.mxu1 %vm1439_vm1, %v1261_v17 }
  0x25   :  { %1266 = vmatpush3.bf16.xpose.msk.msra.mxu0 %vm1439_vm1, %v1261_v17  ;;  %1297 = vmatpush3.bf16.xpose.msk.msra.mxu1 %vm1439_vm1, %v1261_v17 }
  0x26   :  { %1269 = vmatprep.subr.msk.bf16.mxu0 %vm1439_vm1, %v1267_v20  ;;  %1290 = vmatprep.subr.msk.bf16.mxu1 %vm1439_vm1, %v1267_v20 }
  0x2d   :  { %1272 = vmatpush3.bf16.xpose.msk.msra.mxu0 %vm1439_vm1, %v1267_v20  ;;  %1298 = vmatpush3.bf16.xpose.msk.msra.mxu1 %vm1439_vm1, %v1267_v20 }
  0x2e   :  { %1275 = vmatprep.subr.msk.bf16.mxu0 %vm1439_vm1, %v1273_v23  ;;  %1291 = vmatprep.subr.msk.bf16.mxu1 %vm1439_vm1, %v1273_v23 }
  0x35   :  { %1278 = vmatpush3.bf16.xpose.msk.msra.mxu0 %vm1439_vm1, %v1273_v23  ;;  %1299 = vmatpush3.bf16.xpose.msk.msra.mxu1 %vm1439_vm1, %v1273_v23 }
  0x36   :  { %1281 = vmatprep.subr.msk.bf16.mxu0 %vm1439_vm1, %v1279_v26  ;;  %1292 = vmatprep.subr.msk.bf16.mxu1 %vm1439_vm1, %v1279_v26 }
  0x3d   :  { %1284 = vmatpush3.bf16.xpose.msk.msra.mxu0 %vm1439_vm1, %v1279_v26  ;;  %1300 = vmatpush3.bf16.xpose.msk.msra.mxu1 %vm1439_vm1, %v1279_v26 }
  0x44   :  { %1226 = vmatmul.mubr.msk.f32.vlgmr.msra.gmra.mrb[0].mxu0 %vm46_vm0, %v16_v27  ;;  %1232 = vmatmul.mubr.msk.f32.vlgmr.msra.gmra.mrb[0].mxu1 %vm46_vm0, %v20_v28  ;;  %v1399_v28 = vmov 683565275  }
  0x45   :  { %1228 = vmatprep.mubr.msk.f32.mxu0 %vm46_vm0, %v17_v29  ;;  %1234 = vmatprep.mubr.msk.f32.mxu1 %vm46_vm0, %v21_v30 }
  0x48   :  { %1229 = vmatmul.mubr.msk.f32.gmra.mrb[2].mxu0 %vm46_vm0, %v18_v31  ;;  %1235 = vmatmul.mubr.msk.f32.gmra.mrb[2].mxu1 %vm46_vm0, %v22_v32  ;;  %v1400_v32 = vmov 2475754826  }
 0x117   :  { %v1227_v34 = vpop.f32.mrb[0].mxu0  ;;  %v1233_v35 = vpop.f32.mrb[0].mxu1 }
 0x118   :  { %v191_v36 = vadd.f32 %v1227_v34, %v1112_v33  ;;  %v211_v37 = vadd.f32 %v1233_v35, %v1112_v33  ;;  %v185_v38 = vpop.f32.mrb[1].mxu0  ;;  %v205_v39 = vpop.f32.mrb[1].mxu1  ;;  %v1401_v34 = vmov 2131351028  }
 0x119   :  { %v186_v40 = vadd.f32 %v1112_v33, %v185_v38  ;;  %v206_v48 = vadd.f32 %v1112_v33, %v205_v39  ;;  %v1403_v38 = vmov 920167782  }
 0x11a   :  { %v225_v41 = vand.u32 2147483647, %v191_v36  ;;  %v229_v42 = vand.u32 2147483647, %v211_v37 }
 0x11b   :  { %v224_v43 = vand.u32 2147483647, %v186_v40  ;;  %v1230_v44 = vpop.f32.mrb[2].mxu0  ;;  %v1236_v45 = vpop.f32.mrb[2].mxu1  ;;  %v228_v56 = vand.u32 2147483647, %v206_v48 }
 0x11c   :  { %v233_v46 = vadd.f32 1.0, %v225_v41  ;;  %v237_v47 = vadd.f32 1.0, %v229_v42  ;;  %v195_v49 = vpop.f32.mrb[3].mxu0  ;;  %v1589_v60 = vpop.f32.mrb[3].mxu1  ;;  %v1599_v15 = vadd.f32 %v1230_v44, %v1112_v33  ;;  %v1601_v17 = vadd.f32 %v1236_v45, %v1112_v33 }
 0x11d   :  { %v232_v50 = vadd.f32 1.0, %v224_v43  ;;  %v236_v1 = vadd.f32 1.0, %v228_v56  ;;  %v1603_v18 = vadd.f32 %v1112_v33, %v195_v49  ;;  %v1404_v45 = vmov 1326507024  }
 0x11e   :  { %v241_v51 = vmul.f32 30.0, %v233_v46  ;;  %v245_v52 = vmul.f32 30.0, %v237_v47 }
 0x11f   :  { %v240_v53 = vmul.f32 30.0, %v232_v50  ;;  %v244_v10 = vmul.f32 30.0, %v236_v1 }
 0x120   :  { %v1581_v54 = vmul.f32 %v241_v51, %v191_v36  ;;  %v1583_v55 = vmul.f32 %v245_v52, %v211_v37  ;;  %v1402_v36 = vmov 2102212464  }
 0x121   :  { %v1585_v57 = vmul.f32 %v240_v53, %v186_v40  ;;  %v1605_v22 = vmul.f32 %v244_v10, %v206_v48 }
 0x122   :  { %v360_v58 = vand.u32 2147483647, %v1581_v54  ;;  %v363_v59 = vand.u32 2139095040, %v1581_v54  ;;  %v776_v61 = vand.u32 2147483647, %v1583_v55  ;;  %v779_v62 = vand.u32 2139095040, %v1583_v55 }
 0x123   :  { %v259_v4 = vand.u32 2139095040, %v1585_v57  ;;  %v256_v13 = vand.u32 2147483647, %v1585_v57  ;;  %vm362_vm15 = vcmp.lt.s32.totalorder %v1581_v54, 0 }
 0x124   :  { %v364_v63 = vshrl.u32 %v363_v59, 23  ;;  %v367_v0 = vand.u32 8388607, %v360_v58  ;;  %v780_v2 = vshrl.u32 %v779_v62, 23  ;;  %v783_v3 = vand.u32 8388607, %v776_v61 }
 0x125   :  { %v260_v7 = vshrl.u32 %v259_v4, 23  ;;  %v1613_v25 = vand.u32 8388607, %v256_v13  ;;  %vm1693_vm14 = vcmp.le.f32.partialorder %v360_v58, 0.7853982 }
 0x126   :  { %v1141_v5 = vadd.s32 4294967169, %v364_v63  ;;  %v1157_v6 = vadd.s32 4294967169, %v780_v2  ;;  %v368_v8 = vor.u32 8388608, %v367_v0  ;;  %v784_v11 = vor.u32 8388608, %v783_v3 }
 0x127   :  { %v1137_v14 = vadd.s32 4294967169, %v260_v7 }
 0x128   :  { %v370_v9 = vadd.s32 1, %v1141_v5  ;;  %v786_v12 = vadd.s32 1, %v1157_v6  ;;  %v1607_v23 = vshll.u32 %v368_v8, 8  ;;  %v1609_v24 = vshll.u32 %v784_v11, 8 }
 0x129   :  { %v1615_v26 = vadd.s32 1, %v1137_v14 }
 0x12a   :  { %vm371_vm2 = vcmp.gt.s32.totalorder %v370_v9, 0  ;;  %vm787_vm3 = vcmp.gt.s32.totalorder %v786_v12, 0 }
 0x12b   :  { %v372_v16 = vsel %vm371_vm2, %v370_v9, 0  ;;  %v788_v21 = vsel %vm787_vm3, %v786_v12, 0  ;;  %vm267_vm8 = vcmp.gt.s32.totalorder %v1615_v26, 0 }
 0x12c   :  { %v373_v19 = vshrl.u32 %v372_v16, 5  ;;  %v374_v20 = vand.u32 31, %v372_v16  ;;  %v1618_v30 = vshrl.u32 %v788_v21, 5  ;;  %v790_v31 = vand.u32 31, %v788_v21 }
 0x12e   :  { %v375_v27 = vsub.s32 32, %v374_v20  ;;  %v377_v29 = vshll.u32 %v1399_v28, %v374_v20  ;;  %v380_v33 = vshll.u32 %v1400_v32, %v374_v20  ;;  %v383_v35 = vshll.u32 %v1401_v34, %v374_v20 }
 0x12f   :  { %v386_v37 = vshll.u32 %v1402_v36, %v374_v20  ;;  %v389_v39 = vshll.u32 %v1403_v38, %v374_v20  ;;  %vm392_vm4 = vcmp.lt.s32.totalorder %v373_v19, 1  ;;  %vm393_vm5 = vcmp.lt.s32.totalorder %v373_v19, 2 }
 0x130   :  { %v378_v40 = vshrl.u32 %v1400_v32, %v375_v27  ;;  %v381_v41 = vshrl.u32 %v1401_v34, %v375_v27  ;;  %v384_v42 = vshrl.u32 %v1402_v36, %v375_v27  ;;  %v376_v43 = vshrl.u32 %v1399_v28, %v375_v27 }
 0x131   :  { %v387_v44 = vshrl.u32 %v1403_v38, %v375_v27  ;;  %v390_v46 = vshrl.u32 %v1404_v45, %v375_v27  ;;  %v791_v50 = vsub.s32 32, %v790_v31  ;;  %vm394_vm6 = vcmp.lt.s32.totalorder %v373_v19, 3 }
 0x132   :  { %v379_v47 = vor.u32 %v378_v40, %v377_v29  ;;  %v382_v48 = vor.u32 %v381_v41, %v380_v33  ;;  %v385_v49 = vor.u32 %v384_v42, %v383_v35  ;;  %vm395_vm7 = vcmp.lt.s32.totalorder %v373_v19, 4 }
 0x133   :  { %v388_v51 = vor.u32 %v387_v44, %v386_v37  ;;  %v391_v52 = vor.u32 %v390_v46, %v389_v39  ;;  %v793_v2 = vshll.u32 %v1399_v28, %v790_v31  ;;  %v794_v5 = vshrl.u32 %v1400_v32, %v791_v50 }
 0x134   :  { %v396_v53 = vsel %vm392_vm4, %v376_v43, %v379_v47  ;;  %v397_v56 = vsel %vm395_vm7, %v385_v49, 2102212464  ;;  %v400_v59 = vsel %vm392_vm4, %v379_v47, %v382_v48  ;;  %v404_v62 = vsel %vm392_vm4, %v382_v48, %v385_v49 }
 0x135   :  { %v398_v63 = vsel %vm394_vm6, %v382_v48, %v397_v56  ;;  %v401_v0 = vsel %vm395_vm7, %v388_v51, 920167782  ;;  %v405_v1 = vsel %vm395_vm7, %v391_v52, 1326507024  ;;  %v796_v6 = vshll.u32 %v1400_v32, %v790_v31 }
 0x136   :  { %v402_v3 = vsel %vm394_vm6, %v385_v49, %v401_v0  ;;  %v406_v4 = vsel %vm394_vm6, %v388_v51, %v405_v1  ;;  %v399_v7 = vsel %vm393_vm5, %v396_v53, %v398_v63  ;;  %v797_v10 = vshrl.u32 %v1401_v34, %v791_v50 }
 0x137   :  { %v403_v8 = vsel %vm393_vm5, %v400_v59, %v402_v3  ;;  %v407_v9 = vsel %vm393_vm5, %v404_v62, %v406_v4  ;;  %v795_v20 = vor.u32 %v794_v5, %v793_v2  ;;  %v799_v27 = vshll.u32 %v1401_v34, %v790_v31 }
 0x138   :  { %v1642_v11 = vmul.u32.u64.low %v1607_v23, %v407_v9  ;;  %v1643_v12 = vmul.u32.u64.high %v1607_v23, %v407_v9, %v1642_v11  ;;  %v1646_v14 = vmul.u32.u64.low %v1607_v23, %v403_v8  ;;  %v1647_v16 = vmul.u32.u64.high %v1607_v23, %v403_v8, %v1646_v14 }
 0x139   :  { %v798_v21 = vor.u32 %v797_v10, %v796_v6  ;;  %v800_v29 = vshrl.u32 %v1402_v36, %v791_v50  ;;  %v792_v19 = vshrl.u32 %v1399_v28, %v791_v50  ;;  %v802_v33 = vshll.u32 %v1402_v36, %v790_v31 }
 0x13a   :  { %v803_v35 = vshrl.u32 %v1403_v38, %v791_v50  ;;  %v806_v37 = vshrl.u32 %v1404_v45, %v791_v50  ;;  %v415_v39 = vmul.u32 %v1607_v23, %v399_v7  ;;  %v805_v41 = vshll.u32 %v1403_v38, %v790_v31 }
 0x13b   :  { %v801_v40 = vor.u32 %v800_v29, %v799_v27  ;;  %vm808_vm9 = vcmp.lt.s32.totalorder %v1618_v30, 1  ;;  %vm417_vm10 = vc.u32 %v1643_v12, %v1646_v14  ;;  %v418_v42 = vadd.s32 1, %v1647_v16 }
 0x13c   :  { %v804_v43 = vor.u32 %v803_v35, %v802_v33  ;;  %vm809_vm11 = vcmp.lt.s32.totalorder %v1618_v30, 2  ;;  %v807_v44 = vor.u32 %v806_v37, %v805_v41  ;;  %vm810_vm12 = vcmp.lt.s32.totalorder %v1618_v30, 3 }
 0x13d   :  { %vm811_vm13 = vcmp.lt.s32.totalorder %v1618_v30, 4  ;;  %v816_v46 = vsel %vm808_vm9, %v795_v20, %v798_v21  ;;  %v419_v23 = vsel %vm417_vm10, %v418_v42, %v1647_v16  ;;  %v820_v48 = vsel %vm808_vm9, %v798_v21, %v801_v40 }
 0x13e   :  { %v813_v47 = vsel %vm811_vm13, %v801_v40, 2102212464  ;;  %v817_v31 = vsel %vm811_vm13, %v804_v43, 920167782  ;;  %v420_v49 = vadd.s32 %v419_v23, %v415_v39  ;;  %v812_v50 = vsel %vm808_vm9, %v792_v19, %v795_v20 }
 0x13f   :  { %v818_v51 = vsel %vm810_vm12, %v801_v40, %v817_v31  ;;  %v821_v52 = vsel %vm811_vm13, %v807_v44, 1326507024  ;;  %v814_v53 = vsel %vm810_vm12, %v798_v21, %v813_v47  ;;  %v268_v62 = vsel %vm267_vm8, %v1615_v26, 0 }
 0x140   :  { %v819_v56 = vsel %vm809_vm11, %v816_v46, %v818_v51  ;;  %v822_v59 = vsel %vm810_vm12, %v804_v43, %v821_v52  ;;  %v421_v63 = vadd.s32 536870912, %v420_v49  ;;  %v815_v6 = vsel %vm809_vm11, %v812_v50, %v814_v53 }
 0x141   :  { %v823_v0 = vsel %vm809_vm11, %v820_v48, %v822_v59  ;;  %v1674_v1 = vmul.u32.u64.low %v1609_v24, %v819_v56  ;;  %v1675_v2 = vmul.u32.u64.high %v1609_v24, %v819_v56, %v1674_v1  ;;  %v270_v7 = vand.u32 31, %v268_v62 }
 0x142   :  { %v1679_v3 = vmul.u32.u64.low %v1609_v24, %v823_v0  ;;  %v1680_v4 = vmul.u32.u64.high %v1609_v24, %v823_v0, %v1679_v3  ;;  %v422_v5 = vshrl.u32 %v421_v63, 30  ;;  %v672_v26 = vand.u32 2147483647, %v1605_v22 }
 0x143   :  { %v264_v8 = vor.u32 8388608, %v1613_v25  ;;  %v675_v9 = vand.u32 2139095040, %v1605_v22  ;;  %v227_v10 = vand.u32 2147483647, %v1599_v15  ;;  %v231_v11 = vand.u32 2147483647, %v1601_v17 }
 0x144   :  { %v423_v16 = vshll.u32 %v422_v5, 30  ;;  %v834_v20 = vadd.s32 1, %v1675_v2  ;;  %v271_v21 = vsub.s32 32, %v270_v7  ;;  %v226_v27 = vand.u32 2147483647, %v1603_v18 }
 0x145   :  { %v831_v25 = vmul.u32 %v1609_v24, %v815_v6  ;;  %vm833_vm0 = vc.u32 %v1680_v4, %v1674_v1  ;;  %v446_v19 = vsub.s32 4, %v422_v5  ;;  %v1706_v35 = vand.u32 8388607, %v672_v26 }
 0x146   :  { %v1701_v29 = vsub.s32 %v420_v49, %v423_v16  ;;  %v835_v33 = vsel %vm833_vm0, %v834_v20, %v1675_v2  ;;  %v274_v37 = vshrl.u32 %v1400_v32, %v271_v21  ;;  %v1709_v39 = vshll.u32 %v264_v8, 8 }
 0x147   :  { %v836_v58 = vadd.s32 %v835_v33, %v831_v25  ;;  %v676_v40 = vshrl.u32 %v675_v9, 23  ;;  %v416_v24 = vadd.s32 %v1646_v14, %v1643_v12  ;;  %v277_v42 = vshrl.u32 %v1401_v34, %v271_v21 }
 0x148   :  { %v426_v41 = vsub.s32 0, %v1701_v29  ;;  %v280_v43 = vshrl.u32 %v1402_v36, %v271_v21  ;;  %v1716_v46 = vshrl.u32 %v268_v62, 5  ;;  %v273_v23 = vshll.u32 %v1399_v28, %v270_v7 }
 0x149   :  { %v837_v44 = vadd.s32 536870912, %v836_v58  ;;  %v276_v47 = vshll.u32 %v1400_v32, %v270_v7  ;;  %v447_v48 = vsel %vm362_vm15, %v446_v19, %v422_v5  ;;  %v279_v12 = vshll.u32 %v1401_v34, %v270_v7 }
 0x14a   :  { %v1142_v31 = vmin.u32 %v426_v41, %v1701_v29  ;;  %v283_v14 = vshrl.u32 %v1403_v38, %v271_v21  ;;  %v275_v50 = vor.u32 %v274_v37, %v273_v23  ;;  %v282_v51 = vshll.u32 %v1402_v36, %v270_v7 }
 0x14b   :  { %v1725_v49 = vshrl.u32 %v837_v44, 30  ;;  %v286_v52 = vshrl.u32 %v1404_v45, %v271_v21  ;;  %v278_v56 = vor.u32 %v277_v42, %v276_v47  ;;  %v281_v59 = vor.u32 %v280_v43, %v279_v12 }
 0x14c   :  { %v428_v53 = vclz %v1142_v31  ;;  %v285_v62 = vshll.u32 %v1403_v38, %v270_v7  ;;  %v284_v0 = vor.u32 %v283_v14, %v282_v51  ;;  %vm288_vm1 = vcmp.lt.s32.totalorder %v1716_v46, 1 }
 0x14d   :  { %v839_v63 = vshll.u32 %v1725_v49, 30  ;;  %v1153_v2 = vadd.s32 4294967169, %v676_v40  ;;  %v449_v5 = vsel %vm1693_vm14, 0, %v447_v48  ;;  %vm291_vm2 = vcmp.lt.s32.totalorder %v1716_v46, 4 }
 0x14e   :  { %v1143_v3 = vadd.s32 4294967294, %v428_v53  ;;  %v287_v6 = vor.u32 %v286_v52, %v285_v62  ;;  %vm289_vm3 = vcmp.lt.s32.totalorder %v1716_v46, 2  ;;  %vm290_vm4 = vcmp.lt.s32.totalorder %v1716_v46, 3 }
 0x14f   :  { %v1735_v8 = vsub.s32 %v836_v58, %v839_v63  ;;  %v297_v7 = vsel %vm291_vm2, %v284_v0, 920167782  ;;  %v272_v9 = vshrl.u32 %v1399_v28, %v271_v21  ;;  %v296_v16 = vsel %vm288_vm1, %v275_v50, %v278_v56 }
 0x150   :  { %vm1144_vm5 = vcmp.lt.s32.totalorder %v1143_v3, 0  ;;  %v298_v20 = vsel %vm290_vm4, %v281_v59, %v297_v7  ;;  %v453_v19 = vadd.s32 3, %v449_v5  ;;  %v300_v58 = vsel %vm288_vm1, %v278_v56, %v281_v59 }
 0x151   :  { %v431_v25 = vsel %vm1144_vm5, 0, %v1143_v3  ;;  %v842_v33 = vsub.s32 0, %v1735_v8  ;;  %vm778_vm6 = vcmp.lt.s32.totalorder %v1583_v55, 0  ;;  %v293_v21 = vsel %vm291_vm2, %v281_v59, 2102212464 }
 0x152   :  { %v432_v37 = vsub.s32 32, %v431_v25  ;;  %v436_v40 = vsub.s32 4294967266, %v431_v25  ;;  %v301_v41 = vsel %vm291_vm2, %v287_v6, 1326507024  ;;  %v433_v42 = vshll.u32 %v1701_v29, %v431_v25 }
 0x153   :  { %v1158_v43 = vmin.u32 %v842_v33, %v1735_v8  ;;  %v299_v44 = vsel %vm289_vm3, %v296_v16, %v298_v20  ;;  %v302_v23 = vsel %vm290_vm4, %v284_v0, %v301_v41  ;;  %v682_v12 = vadd.s32 1, %v1153_v2 }
 0x154   :  { %v434_v47 = vshrl.u32 %v416_v24, %v432_v37  ;;  %v437_v31 = vadd.s32 127, %v436_v40  ;;  %v303_v48 = vsel %vm289_vm3, %v300_v58, %v302_v23  ;;  %v862_v51 = vsub.s32 4, %v1725_v49 }
 0x155   :  { %v844_v14 = vclz %v1158_v43  ;;  %v292_v29 = vsel %vm288_vm1, %v272_v9, %v275_v50  ;;  %v294_v52 = vsel %vm290_vm4, %v278_v56, %v293_v21  ;;  %vm683_vm7 = vcmp.gt.s32.totalorder %v682_v12, 0 }
 0x156   :  { %v435_v53 = vor.u32 %v434_v47, %v433_v42  ;;  %v438_v59 = vshll.u32 %v437_v31, 23  ;;  %v1768_v62 = vmul.u32.u64.low %v1709_v39, %v303_v48  ;;  %v1769_v63 = vmul.u32.u64.high %v1709_v39, %v303_v48, %v1768_v62 }
 0x157   :  { %v1159_v24 = vadd.s32 4294967294, %v844_v14  ;;  %v1772_v0 = vmul.u32.u64.low %v1709_v39, %v299_v44  ;;  %v1773_v3 = vmul.u32.u64.high %v1709_v39, %v299_v44, %v1772_v0  ;;  %v832_v50 = vadd.s32 %v1674_v1, %v1680_v4 }
 0x158   :  { %v439_v2 = vor.u32 4788187, %v438_v59  ;;  %v680_v5 = vor.u32 8388608, %v1706_v35  ;;  %v684_v56 = vsel %vm683_vm7, %v682_v12, 0  ;;  %v1779_v6 = vand.u32 3, %v453_v19 }
 0x159   :  { %vm1160_vm8 = vcmp.lt.s32.totalorder %v1159_v24, 0  ;;  %v295_v7 = vsel %vm289_vm3, %v292_v29, %v294_v52  ;;  %v686_v9 = vand.u32 31, %v684_v56  ;;  %v442_v20 = vcvt.s32.f32 %v435_v53 }
 0x15a   :  { %v440_v16 = vand.u32 2147483647, %v439_v2  ;;  %v847_v25 = vsel %vm1160_vm8, 0, %v1159_v24  ;;  %vm313_vm9 = vc.u32 %v1769_v63, %v1772_v0  ;;  %v1788_v1 = vsel %vm778_vm6, %v862_v51, %v1725_v49 }
 0x15b   :  { %v848_v33 = vsub.s32 32, %v847_v25  ;;  %v852_v58 = vsub.s32 4294967266, %v847_v25  ;;  %v314_v4 = vadd.s32 1, %v1773_v3  ;;  %v311_v46 = vmul.u32 %v1709_v39, %v295_v7 }
 0x15c   :  { %v443_v35 = vmul.f32 %v442_v20, %v440_v16  ;;  %v1792_v19 = vshrl.u32 %v684_v56, 5  ;;  %v687_v37 = vsub.s32 32, %v686_v9  ;;  %v849_v40 = vshll.u32 %v1735_v8, %v847_v25 }
 0x15d   :  { %v850_v21 = vshrl.u32 %v832_v50, %v848_v33  ;;  %v853_v41 = vadd.s32 127, %v852_v58  ;;  %v315_v42 = vsel %vm313_vm9, %v314_v4, %v1773_v3  ;;  %v689_v23 = vshll.u32 %v1399_v28, %v686_v9 }
 0x15e   :  { %v444_v43 = vxor.u32 2147483648, %v443_v35  ;;  %v316_v44 = vadd.s32 %v315_v42, %v311_v46  ;;  %v690_v49 = vshrl.u32 %v1400_v32, %v687_v37  ;;  %v692_v48 = vshll.u32 %v1400_v32, %v686_v9 }
 0x15f   :  { %v851_v47 = vor.u32 %v850_v21, %v849_v40  ;;  %v854_v31 = vshll.u32 %v853_v41, 23  ;;  %v693_v39 = vshrl.u32 %v1401_v34, %v687_v37  ;;  %v695_v14 = vshll.u32 %v1401_v34, %v686_v9 }
 0x160   :  { %v445_v12 = vsel %vm362_vm15, %v444_v43, %v443_v35  ;;  %v317_v8 = vadd.s32 536870912, %v316_v44  ;;  %v696_v51 = vshrl.u32 %v1402_v36, %v687_v37  ;;  %v691_v53 = vor.u32 %v690_v49, %v689_v23 }
 0x161   :  { %v448_v29 = vsel %vm1693_vm14, %v1581_v54, %v445_v12  ;;  %v855_v52 = vor.u32 4788187, %v854_v31  ;;  %v698_v59 = vshll.u32 %v1402_v36, %v686_v9  ;;  %v858_v62 = vcvt.s32.f32 %v851_v47 }
 0x162   :  { %1342 = vcosq.f32 %v448_v29  ;;  %v1808_v24 = vshrl.u32 %v317_v8, 30  ;;  %v699_v3 = vshrl.u32 %v1403_v38, %v687_v37  ;;  %v694_v50 = vor.u32 %v693_v39, %v692_v48 }
 0x163   :  { %1344 = vsinq.f32 %v448_v29  ;;  %v856_v2 = vand.u32 2147483647, %v855_v52  ;;  %v702_v56 = vshrl.u32 %v1404_v45, %v687_v37  ;;  %v235_v30 = vadd.f32 1.0, %v227_v10 }
 0x164   :  { %v319_v7 = vshll.u32 %v1808_v24, 30  ;;  %v700_v16 = vor.u32 %v699_v3, %v698_v59  ;;  %v1817_v20 = vadd.f32 1.0, %v231_v11  ;;  %vm1821_vm10 = vcmp.le.f32.partialorder %v776_v61, 0.7853982 }
 0x165   :  { %v859_v33 = vmul.f32 %v858_v62, %v856_v2  ;;  %v697_v58 = vor.u32 %v696_v51, %v695_v14  ;;  %v701_v4 = vshll.u32 %v1403_v38, %v686_v9  ;;  %vm459_vm11 = vcmp.eq.s32.totalorder %v1779_v6, 2 }
 0x166   :  { %v865_v10 = vsel %vm1821_vm10, 0, %v1788_v1  ;;  %v1830_v35 = vsub.s32 %v316_v44, %v319_v7  ;;  %vm704_vm12 = vcmp.lt.s32.totalorder %v1792_v19, 1  ;;  %v1833_v11 = vshll.u32 %v680_v5, 8 }
 0x167   :  { %vm456_vm13 = vcmp.eq.s32.totalorder %v1779_v6, 0  ;;  %v860_v61 = vxor.u32 2147483648, %v859_v33  ;;  %v703_v46 = vor.u32 %v702_v56, %v701_v4  ;;  %vm707_vm14 = vcmp.lt.s32.totalorder %v1792_v19, 4 }
 0x168   :  { %v712_v9 = vsel %vm704_vm12, %v691_v53, %v694_v50  ;;  %vm455_vm15 = vcmp.lt.s32.totalorder %v1779_v6, 2  ;;  %v322_v40 = vsub.s32 0, %v1830_v35  ;;  %v688_v1 = vshrl.u32 %v1399_v28, %v687_v37 }
 0x169   :  { %vm706_vm0 = vcmp.lt.s32.totalorder %v1792_v19, 3  ;;  %v713_v5 = vsel %vm707_vm14, %v700_v16, 920167782  ;;  %vm452_vm1 = vweird.f32 %v1581_v54  ;;  %v861_v21 = vsel %vm778_vm6, %v860_v61, %v859_v33 }
 0x16a   :  { %vm258_vm2 = vcmp.lt.s32.totalorder %v1585_v57, 0  ;;  %vm705_vm3 = vcmp.lt.s32.totalorder %v1792_v19, 2  ;;  %v709_v41 = vsel %vm707_vm14, %v697_v58, 2102212464  ;;  %v714_v37 = vsel %vm706_vm0, %v697_v58, %v713_v5 }
 0x16b   :  { %v864_v42 = vsel %vm1821_vm10, %v1583_v55, %v861_v21  ;;  %v1138_v43 = vmin.u32 %v322_v40, %v1830_v35  ;;  %v715_v44 = vsel %vm705_vm3, %v712_v9, %v714_v37  ;;  %v716_v23 = vsel %vm704_vm12, %v694_v50, %v697_v58 }
 0x16c   :  { %1346 = vcosq.f32 %v864_v42  ;;  %v717_v49 = vsel %vm707_vm14, %v703_v46, 1326507024  ;;  %v1865_v47 = vmul.u32.u64.low %v1833_v11, %v715_v44  ;;  %v1866_v31 = vmul.u32.u64.high %v1833_v11, %v715_v44, %v1865_v47  ;;  %v1343_v48 = vpop.eup %1342 }
 0x16d   :  { %1348 = vsinq.f32 %v864_v42  ;;  %v324_v39 = vclz %v1138_v43  ;;  %v708_v12 = vsel %vm704_vm12, %v688_v1, %v691_v53  ;;  %v710_v8 = vsel %vm706_vm0, %v694_v50, %v709_v41  ;;  %v1345_v14 = vpop.eup %1344 }
 0x16e   :  { %v460_v51 = vxor.u32 2147483648, %v1343_v48  ;;  %v869_v29 = vadd.s32 3, %v865_v10  ;;  %v342_v52 = vsub.s32 4, %v1808_v24  ;;  %v718_v59 = vsel %vm706_vm0, %v700_v16, %v717_v49 }
 0x16f   :  { %v457_v62 = vxor.u32 2147483648, %v1345_v14  ;;  %v1139_v3 = vadd.s32 4294967294, %v324_v39  ;;  %v719_v2 = vsel %vm705_vm3, %v716_v23, %v718_v59  ;;  %v243_v56 = vmul.f32 30.0, %v235_v30 }
 0x170   :  { %v461_v53 = vsel %vm459_vm11, %v460_v51, %v1345_v14  ;;  %v711_v50 = vsel %vm705_vm3, %v708_v12, %v710_v8  ;;  %v1883_v7 = vmul.u32.u64.low %v1833_v11, %v719_v2  ;;  %v1884_v25 = vmul.u32.u64.high %v1833_v11, %v719_v2, %v1883_v7 }
 0x171   :  { %v458_v33 = vsel %vm456_vm13, %v1343_v48, %v457_v62  ;;  %vm1140_vm4 = vcmp.lt.s32.totalorder %v1139_v3, 0  ;;  %v730_v16 = vadd.s32 1, %v1866_v31  ;;  %v1890_v58 = vmul.f32 %v243_v56, %v1599_v15 }
 0x172   :  { %v462_v30 = vsel %vm455_vm15, %v458_v33, %v461_v53  ;;  %v870_v4 = vand.u32 3, %v869_v29  ;;  %v312_v19 = vadd.s32 %v1772_v0, %v1769_v63  ;;  %v327_v10 = vsel %vm1140_vm4, 0, %v1139_v3 }
 0x173   :  { %v463_v61 = vsel %vm452_vm1, nan, %v462_v30  ;;  %vm868_vm5 = vweird.f32 %v1583_v55  ;;  %v328_v46 = vsub.s32 32, %v327_v10  ;;  %v332_v9 = vsub.s32 4294967266, %v327_v10 }
 0x174   :  { %v343_v15 = vsel %vm258_vm2, %v342_v52, %v1808_v24  ;;  %1089 = vst [vmem:[#allocation2 + $0x8] sm:$0xff] %v463_v61  ;;  %v329_v6 = vshll.u32 %v1830_v35, %v327_v10  ;;  %v727_v40 = vmul.u32 %v1833_v11, %v711_v50  ;;  %vm729_vm6 = vc.u32 %v1884_v25, %v1865_v47 }
 0x175   :  { %v568_v63 = vand.u32 2147483647, %v1890_v58  ;;  %v330_v54 = vshrl.u32 %v312_v19, %v328_v46  ;;  %v333_v0 = vadd.s32 127, %v332_v9  ;;  %v731_v1 = vsel %vm729_vm6, %v730_v16, %v1866_v31 }
 0x176   :  { %v571_v5 = vand.u32 2139095040, %v1890_v58  ;;  %v1347_v21 = vpop.eup %1346  ;;  %vm872_vm7 = vcmp.eq.s32.totalorder %v870_v4, 0  ;;  %vm1911_vm8 = vcmp.le.f32.partialorder %v256_v13, 0.7853982  ;;  %v732_v35 = vadd.s32 %v731_v1, %v727_v40 }
 0x177   :  { %v247_v11 = vmul.f32 30.0, %v1817_v20  ;;  %v1349_v41 = vpop.eup %1348  ;;  %v876_v37 = vxor.u32 2147483648, %v1347_v21  ;;  %v331_v42 = vor.u32 %v330_v54, %v329_v6  ;;  %v334_v43 = vshll.u32 %v333_v0, 23 }
 0x178   :  { %v572_v44 = vshrl.u32 %v571_v5, 23  ;;  %v873_v23 = vxor.u32 2147483648, %v1349_v41  ;;  %vm875_vm9 = vcmp.eq.s32.totalorder %v870_v4, 2  ;;  %v345_v49 = vsel %vm1911_vm8, 0, %v343_v15 }
 0x179   :  { %v733_v31 = vadd.s32 536870912, %v732_v35  ;;  %v877_v48 = vsel %vm875_vm9, %v876_v37, %v1349_v41  ;;  %v335_v39 = vor.u32 4788187, %v334_v43  ;;  %v575_v12 = vand.u32 8388607, %v568_v63 }
 0x17a   :  { %v1149_v13 = vadd.s32 4294967169, %v572_v44  ;;  %vm871_vm10 = vcmp.lt.s32.totalorder %v870_v4, 2  ;;  %v874_v20 = vsel %vm872_vm7, %v1347_v21, %v873_v23  ;;  %v1922_v14 = vmul.f32 %v247_v11, %v1601_v17 }
 0x17b   :  { %v734_v8 = vshrl.u32 %v733_v31, 30  ;;  %v878_v51 = vsel %vm871_vm10, %v874_v20, %v877_v48  ;;  %v336_v29 = vand.u32 2147483647, %v335_v39  ;;  %v338_v52 = vcvt.s32.f32 %v331_v42 }
 0x17c   :  { %v578_v59 = vadd.s32 1, %v1149_v13  ;;  %v879_v62 = vsel %vm868_vm5, nan, %v878_v51  ;;  %v349_v3 = vadd.s32 3, %v345_v49  ;;  %v576_v53 = vor.u32 8388608, %v575_v12 }
 0x17d   :  { %v735_v2 = vshll.u32 %v734_v8, 30  ;;  %1093 = vst [vmem:[#allocation2 + $0x28] sm:$0xff] %v879_v62  ;;  %v339_v56 = vmul.f32 %v338_v52, %v336_v29  ;;  %v758_v7 = vsub.s32 4, %v734_v8  ;;  %v984_v17 = vand.u32 2147483647, %v1922_v14 }
 0x17e   :  { %vm579_vm11 = vcmp.gt.s32.totalorder %v578_v59, 0  ;;  %v1931_v4 = vadd.f32 1.0, %v226_v27  ;;  %v1933_v55 = vand.u32 3, %v349_v3  ;;  %vm674_vm12 = vcmp.lt.s32.totalorder %v1605_v22, 0 }
 0x17f   :  { %v1926_v50 = vsub.s32 %v732_v35, %v735_v2  ;;  %v580_v33 = vsel %vm579_vm11, %v578_v59, 0  ;;  %v340_v16 = vxor.u32 2147483648, %v339_v56  ;;  %v987_v10 = vand.u32 2139095040, %v1922_v14 }
 0x180   :  { %v582_v30 = vand.u32 31, %v580_v33  ;;  %v728_v46 = vadd.s32 %v1865_v47, %v1884_v25  ;;  %v1942_v15 = vshll.u32 %v576_v53, 8  ;;  %v1950_v40 = vsel %vm674_vm12, %v758_v7, %v734_v8 }
 0x181   :  { %v738_v19 = vsub.s32 0, %v1926_v50  ;;  %v341_v61 = vsel %vm258_vm2, %v340_v16, %v339_v56  ;;  %v1954_v54 = vand.u32 8388607, %v984_v17  ;;  %v581_v0 = vshrl.u32 %v580_v33, 5 }
 0x182   :  { %v583_v9 = vsub.s32 32, %v582_v30  ;;  %v344_v27 = vsel %vm1911_vm8, %v1585_v57, %v341_v61  ;;  %v585_v5 = vshll.u32 %v1399_v28, %v582_v30  ;;  %v988_v21 = vshrl.u32 %v987_v10, 23 }
 0x183   :  { %v1154_v6 = vmin.u32 %v738_v19, %v1926_v50  ;;  %1350 = vcosq.f32 %v344_v27  ;;  %v588_v35 = vshll.u32 %v1400_v32, %v582_v30  ;;  %v591_v11 = vshll.u32 %v1401_v34, %v582_v30 }
 0x184   :  { %v586_v47 = vshrl.u32 %v1400_v32, %v583_v9  ;;  %v589_v25 = vshrl.u32 %v1401_v34, %v583_v9  ;;  %1352 = vsinq.f32 %v344_v27  ;;  %v584_v24 = vshrl.u32 %v1399_v28, %v583_v9 }
 0x185   :  { %v740_v1 = vclz %v1154_v6  ;;  %v592_v41 = vshrl.u32 %v1402_v36, %v583_v9  ;;  %v594_v43 = vshll.u32 %v1402_v36, %v582_v30  ;;  %v595_v44 = vshrl.u32 %v1403_v38, %v583_v9 }
 0x186   :  { %v587_v42 = vor.u32 %v586_v47, %v585_v5  ;;  %vm355_vm13 = vcmp.eq.s32.totalorder %v1933_v55, 2  ;;  %vm1968_vm14 = vcmp.le.f32.partialorder %v672_v26, 0.7853982  ;;  %v590_v49 = vor.u32 %v589_v25, %v588_v35 }
 0x187   :  { %v1155_v37 = vadd.s32 4294967294, %v740_v1  ;;  %v593_v31 = vor.u32 %v592_v41, %v591_v11  ;;  %v597_v48 = vshll.u32 %v1403_v38, %v582_v30  ;;  %v598_v39 = vshrl.u32 %v1404_v45, %v583_v9 }
 0x188   :  { %vm352_vm15 = vcmp.eq.s32.totalorder %v1933_v55, 0  ;;  %v596_v13 = vor.u32 %v595_v44, %v594_v43  ;;  %vm600_vm1 = vcmp.lt.s32.totalorder %v581_v0, 1  ;;  %vm601_vm2 = vcmp.lt.s32.totalorder %v581_v0, 2 }
 0x189   :  { %vm1156_vm0 = vcmp.lt.s32.totalorder %v1155_v37, 0  ;;  %vm351_vm3 = vcmp.lt.s32.totalorder %v1933_v55, 2  ;;  %v599_v20 = vor.u32 %v598_v39, %v597_v48  ;;  %vm602_vm4 = vcmp.lt.s32.totalorder %v581_v0, 3 }
 0x18a   :  { %v743_v12 = vsel %vm1156_vm0, 0, %v1155_v37  ;;  %vm603_vm5 = vcmp.lt.s32.totalorder %v581_v0, 4  ;;  %vm348_vm6 = vweird.f32 %v1585_v57  ;;  %v604_v51 = vsel %vm600_vm1, %v584_v24, %v587_v42 }
 0x18b   :  { %v744_v26 = vsub.s32 32, %v743_v12  ;;  %v748_v8 = vsub.s32 4294967266, %v743_v12  ;;  %v605_v29 = vsel %vm603_vm5, %v593_v31, 2102212464  ;;  %v745_v52 = vshll.u32 %v1926_v50, %v743_v12 }
 0x18c   :  { %v608_v59 = vsel %vm600_vm1, %v587_v42, %v590_v49  ;;  %v609_v62 = vsel %vm603_vm5, %v596_v13, 920167782  ;;  %v612_v3 = vsel %vm600_vm1, %v590_v49, %v593_v31  ;;  %v613_v7 = vsel %vm603_vm5, %v599_v20, 1326507024 }
 0x18d   :  { %v746_v2 = vshrl.u32 %v728_v46, %v744_v26  ;;  %v749_v56 = vadd.s32 127, %v748_v8  ;;  %v610_v53 = vsel %vm602_vm4, %v593_v31, %v609_v62  ;;  %v1351_v33 = vpop.eup %1350  ;;  %v606_v16 = vsel %vm602_vm4, %v590_v49, %v605_v29 }
 0x18e   :  { %v611_v30 = vsel %vm601_vm2, %v608_v59, %v610_v53  ;;  %v614_v19 = vsel %vm602_vm4, %v596_v13, %v613_v7  ;;  %v1165_v10 = vadd.s32 4294967169, %v988_v21  ;;  %v1353_v61 = vpop.eup %1352  ;;  %v356_v9 = vxor.u32 2147483648, %v1351_v33 }
 0x18f   :  { %v747_v27 = vor.u32 %v746_v2, %v745_v52  ;;  %v750_v50 = vshll.u32 %v749_v56, 23  ;;  %v615_v6 = vsel %vm601_vm2, %v612_v3, %v614_v19  ;;  %v353_v47 = vxor.u32 2147483648, %v1353_v61 }
 0x190   :  { %v1984_v46 = vmul.u32.u64.low %v1942_v15, %v615_v6  ;;  %v1985_v25 = vmul.u32.u64.high %v1942_v15, %v615_v6, %v1984_v46  ;;  %v994_v1 = vadd.s32 1, %v1165_v10  ;;  %v357_v5 = vsel %vm355_vm13, %v356_v9, %v1353_v61 }
 0x191   :  { %v751_v24 = vor.u32 4788187, %v750_v50  ;;  %v761_v21 = vsel %vm1968_vm14, 0, %v1950_v40  ;;  %v607_v35 = vsel %vm601_vm2, %v604_v51, %v606_v16  ;;  %v354_v11 = vsel %vm352_vm15, %v1351_v33, %v353_v47 }
 0x192   :  { %v1996_v41 = vmul.u32.u64.low %v1942_v15, %v611_v30  ;;  %v1997_v37 = vmul.u32.u64.high %v1942_v15, %v611_v30, %v1996_v41  ;;  %vm995_vm7 = vcmp.gt.s32.totalorder %v994_v1, 0  ;;  %v358_v42 = vsel %vm351_vm3, %v354_v11, %v357_v5 }
 0x193   :  { %v752_v43 = vand.u32 2147483647, %v751_v24  ;;  %v754_v44 = vcvt.s32.f32 %v747_v27  ;;  %v996_v49 = vsel %vm995_vm7, %v994_v1, 0  ;;  %v359_v40 = vsel %vm348_vm6, nan, %v358_v42 }
 0x194   :  { %v2004_v0 = vshrl.u32 %v996_v49, 5  ;;  %1088 = vst [vmem:[#allocation2] sm:$0xff] %v359_v40  ;;  %vm625_vm8 = vc.u32 %v1985_v25, %v1996_v41  ;;  %v998_v48 = vand.u32 31, %v996_v49  ;;  %v242_v39 = vmul.f32 30.0, %v1931_v4 }
 0x195   :  { %v755_v31 = vmul.f32 %v754_v44, %v752_v43  ;;  %v765_v13 = vadd.s32 3, %v761_v21  ;;  %v623_v55 = vmul.u32 %v1942_v15, %v607_v35  ;;  %v626_v12 = vadd.s32 1, %v1997_v37 }
 0x196   :  { %v992_v20 = vor.u32 8388608, %v1954_v54  ;;  %v999_v57 = vsub.s32 32, %v998_v48  ;;  %v1001_v8 = vshll.u32 %v1399_v28, %v998_v48  ;;  %vm1016_vm9 = vcmp.lt.s32.totalorder %v2004_v0, 1 }
 0x197   :  { %v756_v26 = vxor.u32 2147483648, %v755_v31  ;;  %v627_v51 = vsel %vm625_vm8, %v626_v12, %v1997_v37  ;;  %v1004_v29 = vshll.u32 %v1400_v32, %v998_v48  ;;  %v1007_v52 = vshll.u32 %v1401_v34, %v998_v48 }
 0x198   :  { %v1010_v4 = vshll.u32 %v1402_v36, %v998_v48  ;;  %v628_v59 = vadd.s32 %v627_v51, %v623_v55  ;;  %v1002_v54 = vshrl.u32 %v1400_v32, %v999_v57  ;;  %v1013_v62 = vshll.u32 %v1403_v38, %v998_v48 }
 0x199   :  { %v757_v15 = vsel %vm674_vm12, %v756_v26, %v755_v31  ;;  %v1005_v2 = vshrl.u32 %v1401_v34, %v999_v57  ;;  %v1008_v56 = vshrl.u32 %v1402_v36, %v999_v57  ;;  %v1011_v53 = vshrl.u32 %v1403_v38, %v999_v57 }
 0x19a   :  { %v760_v3 = vsel %vm1968_vm14, %v1605_v22, %v757_v15  ;;  %v629_v7 = vadd.s32 536870912, %v628_v59  ;;  %v1003_v33 = vor.u32 %v1002_v54, %v1001_v8  ;;  %v1014_v16 = vshrl.u32 %v1404_v45, %v999_v57 }
 0x19b   :  { %1354 = vcosq.f32 %v760_v3  ;;  %v1006_v30 = vor.u32 %v1005_v2, %v1004_v29  ;;  %v1009_v19 = vor.u32 %v1008_v56, %v1007_v52  ;;  %v1012_v10 = vor.u32 %v1011_v53, %v1010_v4 }
 0x19c   :  { %1356 = vsinq.f32 %v760_v3  ;;  %v630_v61 = vshrl.u32 %v629_v7, 30  ;;  %v1015_v9 = vor.u32 %v1014_v16, %v1013_v62  ;;  %vm1017_vm10 = vcmp.lt.s32.totalorder %v2004_v0, 2 }
 0x19d   :  { %vm1019_vm11 = vcmp.lt.s32.totalorder %v2004_v0, 4  ;;  %v1000_v23 = vshrl.u32 %v1399_v28, %v999_v57  ;;  %vm1018_vm12 = vcmp.lt.s32.totalorder %v2004_v0, 3  ;;  %v1024_v27 = vsel %vm1016_vm9, %v1003_v33, %v1006_v30 }
 0x19e   :  { %v1025_v50 = vsel %vm1019_vm11, %v1012_v10, 920167782  ;;  %v631_v6 = vshll.u32 %v630_v61, 30  ;;  %v1021_v47 = vsel %vm1019_vm11, %v1009_v19, 2102212464  ;;  %v1028_v1 = vsel %vm1016_vm9, %v1006_v30, %v1009_v19 }
 0x19f   :  { %v1026_v46 = vsel %vm1018_vm12, %v1009_v19, %v1025_v50  ;;  %v1029_v24 = vsel %vm1019_vm11, %v1015_v9, 1326507024  ;;  %v1032_v21 = vshll.u32 %v992_v20, 8  ;;  %v2040_v35 = vmul.f32 %v242_v39, %v1603_v18  ;;  %v1374_v39 = vld [vmem:[%s2240_s2] ss:$0 sm:$0xff]  ;;  %s1405_s2 = smov [#allocation2]  }
 0x1a0   :  { %v1027_v5 = vsel %vm1017_vm10, %v1024_v27, %v1026_v46  ;;  %v766_v11 = vand.u32 3, %v765_v13  ;;  %v632_v37 = vsub.s32 %v628_v59, %v631_v6  ;;  %v1020_v42 = vsel %vm1016_vm9, %v1000_v23, %v1003_v33  ;;  %s1101_s8 = sshll.u32 %s1405_s2, 4  ;;  %s1102_s8 = int_to_ptr.vmem [resolvable:$true] %s1101_s8 }
 0x1a1   :  { %v1030_v43 = vsel %vm1018_vm12, %v1012_v10, %v1029_v24  ;;  %v1022_v44 = vsel %vm1018_vm12, %v1006_v30, %v1021_v47  ;;  %v2046_v40 = vmul.u32.u64.low %v1032_v21, %v1027_v5  ;;  %v2047_v31 = vmul.u32.u64.high %v1032_v21, %v1027_v5, %v2046_v40  ;;  %s1375_s9 = scalar_lea.vmem %s1102_s8, 1024  ;;  %p1380_p1 = scmp.lt.s32.totalorder %s1102_s8, %s1102_s8 }
 0x1a2   :  { %v1031_v49 = vsel %vm1017_vm10, %v1028_v1, %v1030_v43  ;;  %v634_v48 = vsub.s32 0, %v632_v37  ;;  %vm764_vm13 = vweird.f32 %v1605_v22  ;;  %v467_v18 = vand.u32 2139095040, %v2040_v35  ;;  %p1376_p0 = scmp.ne.s32.totalorder %s1102_s8, %s1375_s9  ;;  %p1381_p2 = scmp.lt.s32.totalorder %s1375_s9, %s1375_s9 }
 0x1a3   :  { %v2049_v55 = vmul.u32.u64.low %v1032_v21, %v1031_v49  ;;  %v2050_v12 = vmul.u32.u64.high %v1032_v21, %v1031_v49, %v2049_v55  ;;  %v2058_v13 = vadd.f32 %v1374_v39, %v1589_v60  ;;  %vm767_vm14 = vcmp.lt.s32.totalorder %v766_v11, 2 }
 0x1a4   :  { %vm570_vm15 = vcmp.lt.s32.totalorder %v1890_v58, 0  ;;  %v1150_v26 = vmin.u32 %v634_v48, %v632_v37  ;;  %v1023_v57 = vsel %vm1017_vm10, %v1020_v42, %v1022_v44  ;;  %v654_v29 = vsub.s32 4, %v630_v61  ;;  %p1382_p3 = por %p1381_p2, %p1380_p1 }
 0x1a5   :  { %v1355_v20 = vpop.eup %1354  ;;  %v1042_v52 = vadd.s32 1, %v2047_v31  ;;  %v468_v4 = vshrl.u32 %v467_v18, 23  ;;  %vm768_vm0 = vcmp.eq.s32.totalorder %v766_v11, 0  ;;  %vm771_vm1 = vcmp.eq.s32.totalorder %v766_v11, 2 }
 0x1a6   :  { %v1357_v8 = vpop.eup %1356  ;;  %v772_v51 = vxor.u32 2147483648, %v1355_v20  ;;  %v636_v59 = vclz %v1150_v26  ;;  %v1039_v54 = vmul.u32 %v1032_v21, %v1023_v57  ;;  %vm1041_vm2 = vc.u32 %v2050_v12, %v2046_v40  ;;  %p1383_p4 = pnand %p1382_p3, %p1376_p0 }
 0x1a7   :  { %v769_v15 = vxor.u32 2147483648, %v1357_v8  ;;  %v464_v62 = vand.u32 2147483647, %v2040_v35  ;;  %v1043_v0 = vsel %vm1041_vm2, %v1042_v52, %v2047_v31  ;;  %v1145_v56 = vadd.s32 4294967169, %v468_v4 }
 0x1a8   :  { %v773_v60 = vsel %vm771_vm1, %v772_v51, %v1357_v8  ;;  %v1151_v2 = vadd.s32 4294967294, %v636_v59  ;;  %v655_v7 = vsel %vm570_vm15, %v654_v29, %v630_v61  ;;  %v1044_v33 = vadd.s32 %v1043_v0, %v1039_v54 }
 0x1a9   :  { %v770_v3 = vsel %vm768_vm0, %v1355_v20, %v769_v15  ;;  %v230_v16 = vand.u32 2147483647, %v2058_v13  ;;  %v474_v19 = vadd.s32 1, %v1145_v56  ;;  %vm2075_vm4 = vcmp.le.f32.partialorder %v568_v63, 0.7853982 }
 0x1aa   :  { %v774_v53 = vsel %vm767_vm14, %v770_v3, %v773_v60  ;;  %vm1152_vm3 = vcmp.lt.s32.totalorder %v1151_v2, 0  ;;  %v624_v9 = vadd.s32 %v1996_v41, %v1985_v25  ;;  %v1045_v61 = vadd.s32 536870912, %v1044_v33 }
 0x1ab   :  { %v775_v30 = vsel %vm764_vm13, nan, %v774_v53  ;;  %v639_v23 = vsel %vm1152_vm3, 0, %v1151_v2  ;;  %v657_v22 = vsel %vm2075_vm4, 0, %v655_v7  ;;  %vm475_vm5 = vcmp.gt.s32.totalorder %v474_v19, 0 }
 0x1ac   :  { %1092 = vst [vmem:[#allocation2 + $0x20] sm:$0xff] %v775_v30  ;;  %v640_v27 = vsub.s32 32, %v639_v23  ;;  %v644_v50 = vsub.s32 4294967266, %v639_v23  ;;  %v1046_v6 = vshrl.u32 %v1045_v61, 30  ;;  %v471_v47 = vand.u32 8388607, %v464_v62 }
 0x1ad   :  { %v476_v46 = vsel %vm475_vm5, %v474_v19, 0  ;;  %v238_v63 = vadd.f32 1.0, %v230_v16  ;;  %v641_v1 = vshll.u32 %v632_v37, %v639_v23  ;;  %vm986_vm6 = vcmp.lt.s32.totalorder %v1922_v14, 0 }
 0x1ae   :  { %v642_v5 = vshrl.u32 %v624_v9, %v640_v27  ;;  %v645_v24 = vadd.s32 127, %v644_v50  ;;  %v478_v21 = vand.u32 31, %v476_v46  ;;  %v1047_v11 = vshll.u32 %v1046_v6, 30 }
 0x1af   :  { %v2086_v43 = vadd.s32 3, %v657_v22  ;;  %v1040_v44 = vadd.s32 %v2046_v40, %v2050_v12  ;;  %v472_v31 = vor.u32 8388608, %v471_v47  ;;  %v1070_v55 = vsub.s32 4, %v1046_v6 }
 0x1b0   :  { %v643_v25 = vor.u32 %v642_v5, %v641_v1  ;;  %v646_v41 = vshll.u32 %v645_v24, 23  ;;  %v479_v42 = vsub.s32 32, %v478_v21  ;;  %v1048_v49 = vsub.s32 %v1044_v33, %v1047_v11 }
 0x1b1   :  { %v2089_v18 = vshrl.u32 %v476_v46, 5  ;;  %v246_v37 = vmul.f32 30.0, %v238_v63  ;;  %v487_v57 = vshll.u32 %v1401_v34, %v478_v21  ;;  %v481_v52 = vshll.u32 %v1399_v28, %v478_v21 }
 0x1b2   :  { %v647_v48 = vor.u32 4788187, %v646_v41  ;;  %v1050_v39 = vsub.s32 0, %v1048_v49  ;;  %v482_v20 = vshrl.u32 %v1400_v32, %v479_v42  ;;  %v485_v26 = vshrl.u32 %v1401_v34, %v479_v42 }
 0x1b3   :  { %v650_v51 = vcvt.s32.f32 %v643_v25  ;;  %v488_v29 = vshrl.u32 %v1402_v36, %v479_v42  ;;  %v491_v40 = vshrl.u32 %v1403_v38, %v479_v42  ;;  %v484_v4 = vshll.u32 %v1400_v32, %v478_v21 }
 0x1b4   :  { %v648_v8 = vand.u32 2147483647, %v647_v48  ;;  %v1166_v12 = vmin.u32 %v1050_v39, %v1048_v49  ;;  %v490_v15 = vshll.u32 %v1402_v36, %v478_v21  ;;  %v2099_v54 = vshll.u32 %v472_v31, 8 }
 0x1b5   :  { %v489_v60 = vor.u32 %v488_v29, %v487_v57  ;;  %v2102_v3 = vmul.f32 %v246_v37, %v2058_v13  ;;  %v483_v0 = vor.u32 %v482_v20, %v481_v52  ;;  %v486_v56 = vor.u32 %v485_v26, %v484_v4 }
 0x1b6   :  { %v651_v59 = vmul.f32 %v650_v51, %v648_v8  ;;  %v1052_v2 = vclz %v1166_v12  ;;  %v492_v53 = vor.u32 %v491_v40, %v490_v15  ;;  %v1071_v33 = vsel %vm986_vm6, %v1070_v55, %v1046_v6 }
 0x1b7   :  { %v493_v16 = vshll.u32 %v1403_v38, %v478_v21  ;;  %v494_v30 = vshrl.u32 %v1404_v45, %v479_v42  ;;  %v480_v9 = vshrl.u32 %v1399_v28, %v479_v42  ;;  %vm496_vm7 = vcmp.lt.s32.totalorder %v2089_v18, 1 }
 0x1b8   :  { %v652_v7 = vxor.u32 2147483648, %v651_v59  ;;  %v1167_v19 = vadd.s32 4294967294, %v1052_v2  ;;  %vm499_vm8 = vcmp.lt.s32.totalorder %v2089_v18, 4  ;;  %vm498_vm9 = vcmp.lt.s32.totalorder %v2089_v18, 3 }
 0x1b9   :  { %v495_v23 = vor.u32 %v494_v30, %v493_v16  ;;  %v501_v61 = vsel %vm499_vm8, %v489_v60, 2102212464  ;;  %v504_v50 = vsel %vm496_vm7, %v483_v0, %v486_v56  ;;  %v505_v22 = vsel %vm499_vm8, %v492_v53, 920167782 }
 0x1ba   :  { %v653_v13 = vsel %vm570_vm15, %v652_v7, %v651_v59  ;;  %vm1168_vm10 = vcmp.lt.s32.totalorder %v1167_v19, 0  ;;  %vm497_vm11 = vcmp.lt.s32.totalorder %v2089_v18, 2  ;;  %v506_v47 = vsel %vm498_vm9, %v489_v60, %v505_v22 }
 0x1bb   :  { %v656_v27 = vsel %vm2075_vm4, %v1890_v58, %v653_v13  ;;  %v1055_v6 = vsel %vm1168_vm10, 0, %v1167_v19  ;;  %v500_v10 = vsel %vm496_vm7, %v480_v9, %v483_v0  ;;  %v502_v1 = vsel %vm498_vm9, %v486_v56, %v501_v61 }
 0x1bc   :  { %1358 = vcosq.f32 %v656_v27  ;;  %v1056_v46 = vsub.s32 32, %v1055_v6  ;;  %v1060_v63 = vsub.s32 4294967266, %v1055_v6  ;;  %v507_v5 = vsel %vm497_vm11, %v504_v50, %v506_v47 }
 0x1bd   :  { %1360 = vsinq.f32 %v656_v27  ;;  %v508_v24 = vsel %vm496_vm7, %v486_v56, %v489_v60  ;;  %v509_v21 = vsel %vm499_vm8, %v495_v23, 1326507024  ;;  %v1057_v11 = vshll.u32 %v1048_v49, %v1055_v6 }
 0x1be   :  { %v1058_v25 = vshrl.u32 %v1040_v44, %v1056_v46  ;;  %v1061_v41 = vadd.s32 127, %v1060_v63  ;;  %v510_v42 = vsel %vm498_vm9, %v492_v53, %v509_v21  ;;  %v883_v37 = vand.u32 2139095040, %v2102_v3 }
 0x1bf   :  { %v511_v31 = vsel %vm497_vm11, %v508_v24, %v510_v42  ;;  %v2141_v48 = vmul.u32.u64.low %v2099_v54, %v507_v5  ;;  %v2142_v55 = vmul.u32.u64.high %v2099_v54, %v507_v5, %v2141_v48  ;;  %v662_v44 = vand.u32 3, %v2086_v43 }
 0x1c0   :  { %v1059_v39 = vor.u32 %v1058_v25, %v1057_v11  ;;  %v1062_v20 = vshll.u32 %v1061_v41, 23  ;;  %v2147_v26 = vmul.u32.u64.low %v2099_v54, %v511_v31  ;;  %v2148_v49 = vmul.u32.u64.high %v2099_v54, %v511_v31, %v2147_v26 }
 0x1c1   :  { %v503_v57 = vsel %vm497_vm11, %v500_v10, %v502_v1  ;;  %v884_v8 = vshrl.u32 %v883_v37, 23  ;;  %vm2155_vm12 = vcmp.le.f32.partialorder %v984_v17, 0.7853982  ;;  %v522_v12 = vadd.s32 1, %v2142_v55 }
 0x1c2   :  { %v1063_v29 = vor.u32 4788187, %v1062_v20  ;;  %v1073_v40 = vsel %vm2155_vm12, 0, %v1071_v33  ;;  %v1066_v15 = vcvt.s32.f32 %v1059_v39  ;;  %v519_v43 = vmul.u32 %v2099_v54, %v503_v57 }
 0x1c3   :  { %v1161_v52 = vadd.s32 4294967169, %v884_v8  ;;  %vm521_vm13 = vc.u32 %v2148_v49, %v2141_v48  ;;  %vm664_vm14 = vcmp.eq.s32.totalorder %v662_v44, 0  ;;  %v880_v53 = vand.u32 2147483647, %v2102_v3 }
 0x1c4   :  { %v1064_v4 = vand.u32 2147483647, %v1063_v29  ;;  %v523_v17 = vsel %vm521_vm13, %v522_v12, %v2142_v55  ;;  %vm667_vm15 = vcmp.eq.s32.totalorder %v662_v44, 2  ;;  %v1077_v33 = vadd.s32 3, %v1073_v40 }
 0x1c5   :  { %v890_v59 = vadd.s32 1, %v1161_v52  ;;  %v524_v56 = vadd.s32 %v523_v17, %v519_v43  ;;  %vm660_vm1 = vweird.f32 %v1890_v58  ;;  %vm663_vm2 = vcmp.lt.s32.totalorder %v662_v44, 2 }
 0x1c6   :  { %v1359_v18 = vpop.eup %1358  ;;  %v1067_v0 = vmul.f32 %v1066_v15, %v1064_v4  ;;  %v887_v50 = vand.u32 8388607, %v880_v53  ;;  %v1078_v58 = vand.u32 3, %v1077_v33  ;;  %vm1076_vm11 = vweird.f32 %v1922_v14 }
 0x1c7   :  { %v1361_v60 = vpop.eup %1360  ;;  %v668_v2 = vxor.u32 2147483648, %v1359_v18  ;;  %vm891_vm0 = vcmp.gt.s32.totalorder %v890_v59, 0  ;;  %v525_v30 = vadd.s32 536870912, %v524_v56  ;;  %vm466_vm13 = vcmp.lt.s32.totalorder %v2040_v35, 0 }
 0x1c8   :  { %v665_v7 = vxor.u32 2147483648, %v1361_v60  ;;  %v1068_v54 = vxor.u32 2147483648, %v1067_v0  ;;  %v892_v19 = vsel %vm891_vm0, %v890_v59, 0  ;;  %v888_v24 = vor.u32 8388608, %v887_v50 }
 0x1c9   :  { %v669_v16 = vsel %vm667_vm15, %v668_v2, %v1361_v60  ;;  %v894_v13 = vand.u32 31, %v892_v19  ;;  %v2171_v27 = vshrl.u32 %v525_v30, 30  ;;  %v893_v25 = vshrl.u32 %v892_v19, 5 }
 0x1ca   :  { %v666_v9 = vsel %vm664_vm14, %v1359_v18, %v665_v7  ;;  %v1069_v61 = vsel %vm986_vm6, %v1068_v54, %v1067_v0  ;;  %vm1080_vm3 = vcmp.eq.s32.totalorder %v1078_v58, 0  ;;  %vm1079_vm4 = vcmp.lt.s32.totalorder %v1078_v58, 2 }
 0x1cb   :  { %v670_v23 = vsel %vm663_vm2, %v666_v9, %v669_v16  ;;  %v1072_v6 = vsel %vm2155_vm12, %v1922_v14, %v1069_v61  ;;  %v895_v47 = vsub.s32 32, %v894_v13  ;;  %v527_v46 = vshll.u32 %v2171_v27, 30 }
 0x1cc   :  { %v671_v22 = vsel %vm660_vm1, nan, %v670_v23  ;;  %1362 = vcosq.f32 %v1072_v6  ;;  %v897_v63 = vshll.u32 %v1399_v28, %v894_v13  ;;  %v900_v21 = vshll.u32 %v1400_v32, %v894_v13 }
 0x1cd   :  { %1091 = vst [vmem:[#allocation2 + $0x18] sm:$0xff] %v671_v22  ;;  %1364 = vsinq.f32 %v1072_v6  ;;  %v898_v10 = vshrl.u32 %v1400_v32, %v895_v47  ;;  %v901_v1 = vshrl.u32 %v1401_v34, %v895_v47  ;;  %v2182_v5 = vsub.s32 %v524_v56, %v527_v46 }
 0x1ce   :  { %v904_v11 = vshrl.u32 %v1402_v36, %v895_v47  ;;  %v903_v42 = vshll.u32 %v1401_v34, %v894_v13  ;;  %v906_v37 = vshll.u32 %v1402_v36, %v894_v13  ;;  %v907_v39 = vshrl.u32 %v1403_v38, %v895_v47 }
 0x1cf   :  { %v899_v41 = vor.u32 %v898_v10, %v897_v63  ;;  %v530_v31 = vsub.s32 0, %v2182_v5  ;;  %v902_v55 = vor.u32 %v901_v1, %v900_v21  ;;  %v909_v26 = vshll.u32 %v1403_v38, %v894_v13 }
 0x1d0   :  { %v905_v20 = vor.u32 %v904_v11, %v903_v42  ;;  %v910_v44 = vshrl.u32 %v1404_v45, %v895_v47  ;;  %vm1083_vm5 = vcmp.eq.s32.totalorder %v1078_v58, 2  ;;  %v908_v57 = vor.u32 %v907_v39, %v906_v37 }
 0x1d1   :  { %v1146_v32 = vmin.u32 %v530_v31, %v2182_v5  ;;  %v928_v8 = vshll.u32 %v888_v24, 8  ;;  %v896_v34 = vshrl.u32 %v1399_v28, %v895_v47  ;;  %vm912_vm6 = vcmp.lt.s32.totalorder %v893_v25, 1 }
 0x1d2   :  { %v911_v51 = vor.u32 %v910_v44, %v909_v26  ;;  %vm913_vm7 = vcmp.lt.s32.totalorder %v893_v25, 2  ;;  %vm914_vm8 = vcmp.lt.s32.totalorder %v893_v25, 3  ;;  %vm915_vm9 = vcmp.lt.s32.totalorder %v893_v25, 4 }
 0x1d3   :  { %v532_v36 = vclz %v1146_v32  ;;  %v920_v29 = vsel %vm912_vm6, %v899_v41, %v902_v55  ;;  %v917_v40 = vsel %vm915_vm9, %v905_v20, 2102212464  ;;  %v921_v12 = vsel %vm915_vm9, %v908_v57, 920167782 }
 0x1d4   :  { %v924_v38 = vsel %vm912_vm6, %v902_v55, %v905_v20  ;;  %v925_v52 = vsel %vm915_vm9, %v911_v51, 1326507024  ;;  %v916_v15 = vsel %vm912_vm6, %v896_v34, %v899_v41  ;;  %v922_v43 = vsel %vm914_vm8, %v905_v20, %v921_v12 }
 0x1d5   :  { %v1147_v4 = vadd.s32 4294967294, %v532_v36  ;;  %v926_v18 = vsel %vm914_vm8, %v908_v57, %v925_v52  ;;  %v918_v60 = vsel %vm914_vm8, %v902_v55, %v917_v40  ;;  %v923_v28 = vsel %vm913_vm7, %v920_v29, %v922_v43 }
 0x1d6   :  { %v1363_v45 = vpop.eup %1362  ;;  %v927_v2 = vsel %vm913_vm7, %v924_v38, %v926_v18  ;;  %v2200_v54 = vmul.u32.u64.low %v928_v8, %v923_v28  ;;  %v2201_v30 = vmul.u32.u64.high %v928_v8, %v923_v28, %v2200_v54  ;;  %v520_v9 = vadd.s32 %v2141_v48, %v2148_v49 }
 0x1d7   :  { %v1365_v17 = vpop.eup %1364  ;;  %v1084_v59 = vxor.u32 2147483648, %v1363_v45  ;;  %vm1148_vm10 = vcmp.lt.s32.totalorder %v1147_v4, 0  ;;  %v2196_v56 = vmul.u32.u64.low %v928_v8, %v927_v2  ;;  %v2197_v7 = vmul.u32.u64.high %v928_v8, %v927_v2, %v2196_v56 }
 0x1d8   :  { %v1081_v0 = vxor.u32 2147483648, %v1365_v17  ;;  %v535_v16 = vsel %vm1148_vm10, 0, %v1147_v4  ;;  %v919_v50 = vsel %vm913_vm7, %v916_v15, %v918_v60  ;;  %v938_v63 = vadd.s32 1, %v2201_v30 }
 0x1d9   :  { %v1085_v33 = vsel %vm1083_vm5, %v1084_v59, %v1365_v17  ;;  %v536_v13 = vsub.s32 32, %v535_v16  ;;  %v540_v23 = vsub.s32 4294967266, %v535_v16  ;;  %v537_v6 = vshll.u32 %v2182_v5, %v535_v16 }
 0x1da   :  { %v1082_v19 = vsel %vm1080_vm3, %v1363_v45, %v1081_v0  ;;  %vm937_vm12 = vc.u32 %v2197_v7, %v2200_v54  ;;  %v935_v49 = vmul.u32 %v928_v8, %v919_v50  ;;  %v550_v25 = vsub.s32 4, %v2171_v27 }
 0x1db   :  { %v1086_v61 = vsel %vm1079_vm4, %v1082_v19, %v1085_v33  ;;  %v538_v47 = vshrl.u32 %v520_v9, %v536_v13  ;;  %v541_v46 = vadd.s32 127, %v540_v23  ;;  %v939_v1 = vsel %vm937_vm12, %v938_v63, %v2201_v30 }
 0x1dc   :  { %v1087_v22 = vsel %vm1076_vm11, nan, %v1086_v61  ;;  %v940_v58 = vadd.s32 %v939_v1, %v935_v49  ;;  %v551_v55 = vsel %vm466_vm13, %v550_v25, %v2171_v27  ;;  %vm465_vm14 = vcmp.le.f32.partialorder %v464_v62, 0.7853982 }
 0x1dd   :  { %1095 = vst [vmem:[#allocation2 + $0x38] sm:$0xff] %v1087_v22  ;;  %v539_v10 = vor.u32 %v538_v47, %v537_v6  ;;  %v542_v48 = vshll.u32 %v541_v46, 23  ;;  %v553_v26 = vsel %vm465_vm14, 0, %v551_v55  ;;  %v936_v27 = vadd.s32 %v2200_v54, %v2197_v7 }
 0x1de   :  { %v941_v11 = vadd.s32 536870912, %v940_v58  ;;  %v557_v57 = vadd.s32 3, %v553_v26  ;;  %vm556_vm3 = vweird.f32 %v2040_v35  ;;  %vm882_vm4 = vcmp.lt.s32.totalorder %v2102_v3, 0 }
 0x1df   :  { %v543_v14 = vor.u32 4788187, %v542_v48  ;;  %v546_v21 = vcvt.s32.f32 %v539_v10  ;;  %vm881_vm5 = vcmp.le.f32.partialorder %v880_v53, 0.7853982  ;;  %vm972_vm9 = vweird.f32 %v2102_v3 }
 0x1e0   :  { %v942_v41 = vshrl.u32 %v941_v11, 30  ;;  %v558_v51 = vand.u32 3, %v557_v57 }
 0x1e1   :  { %v544_v24 = vand.u32 2147483647, %v543_v14 }
 0x1e2   :  { %v943_v31 = vshll.u32 %v942_v41, 30  ;;  %vm563_vm0 = vcmp.eq.s32.totalorder %v558_v51, 2  ;;  %vm560_vm1 = vcmp.eq.s32.totalorder %v558_v51, 0  ;;  %vm559_vm2 = vcmp.lt.s32.totalorder %v558_v51, 2 }
 0x1e3   :  { %v547_v5 = vmul.f32 %v546_v21, %v544_v24  ;;  %v966_v33 = vsub.s32 4, %v942_v41 }
 0x1e4   :  { %v944_v39 = vsub.s32 %v940_v58, %v943_v31 }
 0x1e5   :  { %v548_v42 = vxor.u32 2147483648, %v547_v5  ;;  %v967_v30 = vsel %vm882_vm4, %v966_v33, %v942_v41 }
 0x1e6   :  { %v946_v44 = vsub.s32 0, %v944_v39 }
 0x1e7   :  { %v549_v37 = vsel %vm466_vm13, %v548_v42, %v547_v5 }
 0x1e8   :  { %v552_v20 = vsel %vm465_vm14, %v2040_v35, %v549_v37  ;;  %v1162_v32 = vmin.u32 %v946_v44, %v944_v39  ;;  %v969_v35 = vsel %vm881_vm5, 0, %v967_v30 }
 0x1e9   :  { %1366 = vcosq.f32 %v552_v20  ;;  %v973_v9 = vadd.s32 3, %v969_v35 }
 0x1ea   :  { %1368 = vsinq.f32 %v552_v20  ;;  %v948_v8 = vclz %v1162_v32 }
 0x1eb   :  { %v974_v13 = vand.u32 3, %v973_v9 }
 0x1ec   :  { %v1163_v34 = vadd.s32 4294967294, %v948_v8 }
 0x1ed   :  { %vm979_vm6 = vcmp.eq.s32.totalorder %v974_v13, 2  ;;  %vm976_vm7 = vcmp.eq.s32.totalorder %v974_v13, 0  ;;  %vm975_vm8 = vcmp.lt.s32.totalorder %v974_v13, 2 }
 0x1ee   :  { %vm1164_vm15 = vcmp.lt.s32.totalorder %v1163_v34, 0 }
 0x1ef   :  { %v951_v36 = vsel %vm1164_vm15, 0, %v1163_v34 }
 0x1f0   :  { %v952_v40 = vsub.s32 32, %v951_v36  ;;  %v956_v62 = vsub.s32 4294967266, %v951_v36  ;;  %v953_v45 = vshll.u32 %v944_v39, %v951_v36 }
 0x1f2   :  { %v954_v4 = vshrl.u32 %v936_v27, %v952_v40  ;;  %v957_v15 = vadd.s32 127, %v956_v62 }
 0x1f3   :  { %v1367_v29 = vpop.eup %1366 }
 0x1f4   :  { %v1369_v12 = vpop.eup %1368  ;;  %v564_v38 = vxor.u32 2147483648, %v1367_v29  ;;  %v955_v17 = vor.u32 %v954_v4, %v953_v45  ;;  %v958_v59 = vshll.u32 %v957_v15, 23 }
 0x1f5   :  { %v561_v52 = vxor.u32 2147483648, %v1369_v12 }
 0x1f6   :  { %v565_v43 = vsel %vm563_vm0, %v564_v38, %v1369_v12  ;;  %v959_v2 = vor.u32 4788187, %v958_v59  ;;  %v962_v56 = vcvt.s32.f32 %v955_v17 }
 0x1f7   :  { %v562_v18 = vsel %vm560_vm1, %v1367_v29, %v561_v52 }
 0x1f8   :  { %v566_v60 = vsel %vm559_vm2, %v562_v18, %v565_v43  ;;  %v960_v0 = vand.u32 2147483647, %v959_v2 }
 0x1f9   :  { %v567_v28 = vsel %vm556_vm3, nan, %v566_v60 }
 0x1fa   :  { %1090 = vst [vmem:[#allocation2 + $0x10] sm:$0xff] %v567_v28  ;;  %v963_v7 = vmul.f32 %v962_v56, %v960_v0 }
 0x1fc   :  { %v964_v16 = vxor.u32 2147483648, %v963_v7 }
 0x1fe   :  { %v965_v54 = vsel %vm882_vm4, %v964_v16, %v963_v7 }
 0x1ff   :  { %v968_v19 = vsel %vm881_vm5, %v2102_v3, %v965_v54 }
 0x200   :  { %1370 = vcosq.f32 %v968_v19 }
 0x201   :  { %1372 = vsinq.f32 %v968_v19 }
 0x20a   :  { %v1371_v23 = vpop.eup %1370 }
 0x20b   :  { %v1373_v61 = vpop.eup %1372  ;;  %v980_v50 = vxor.u32 2147483648, %v1371_v23 }
 0x20c   :  { %v977_v22 = vxor.u32 2147483648, %v1373_v61 }
 0x20d   :  { %v981_v6 = vsel %vm979_vm6, %v980_v50, %v1373_v61 }
 0x20e   :  { %v978_v53 = vsel %vm976_vm7, %v1371_v23, %v977_v22 }
 0x20f   :  { %v982_v47 = vsel %vm975_vm8, %v978_v53, %v981_v6 }
 0x210   :  { %v983_v46 = vsel %vm972_vm9, nan, %v982_v47 }
 0x211   :  { %1094 = vst [vmem:[#allocation2 + $0x30] sm:$0xff] %v983_v46 }
 0x212   :  { %1386 = shalt.err (!%p1383_p4)
}
 0x213   :  { %s1387_s12 = scalar_lea.hbm %s2241_s3, 1024 }
 0x214   :  { %p1388_p5 = scmp.ne.s32.totalorder %s2241_s3, %s1387_s12  ;;  %p1391_p6 = scmp.lt.u32.totalorder %s1387_s12, %s2241_s3 }
 0x216   :  { %p1393_p7 = pnand %p1391_p6, %p1388_p5 }
 0x218   :  { %1396 = shalt.err (!%p1393_p7)
}
 0x219   :  { %s1406_s17 = smov 128   ;;  %s1407_s18 = smov 8  }
 0x21a   :  { %1107 = dma.vmem_to_hbm [thread:$0]  %s1102_s8, 1024, %s2241_s3, [#allocation3], %s1406_s17, %s1406_s17, %s1407_s18  }
 0x21b   :  { %1397 = dma.done.wait [#allocation3], 1024  }
 0x21c   :  { %1398 = vsyncadd [#allocation3], 4294966272 }
 0x21d   :  { %1111 = vsyncpa [#allocation3], 1 }

</bundles_post_ra>
